<compile_context>
chip_gen: v5e
topology: v5e:2x2
jax: 0.10.0
libtpu: 0.0.40
codegen_flags: <defaults>
</compile_context>

<pallas_src>
import math
import functools

import numpy as np
import jax
import jax.numpy as jnp
from jax.experimental import pallas as pl
from jax.experimental.pallas import tpu as pltpu

_LANE = 128
_SUBLANE = 8


# ----------------------------- small helpers ---------------------------------
def _cdiv(a, b):
    return -(-a // b)


def _round_up(x, m):
    return ((x + m - 1) // m) * m


def _vmem_budget_and_limit():
    """(tile budget, vmem_limit_bytes) tuned per TPU generation."""
    kind = ""
    try:
        kind = jax.devices()[0].device_kind.lower()
    except Exception:
        pass
    if any(t in kind for t in ("v4", "v5", "v6")):      # 128 MiB physical VMEM
        return 44 * 1024 * 1024, 64 * 1024 * 1024
    # v7x (64 MiB per TensorCore) or unknown: stay conservative.
    return 12 * 1024 * 1024, 32 * 1024 * 1024


def _vmem_cap_rows(per_row_bytes, fixed_bytes, budget_bytes):
    for cand in (2048, 1024, 512, 256, 128, 64, 32, 16, 8):
        if fixed_bytes + cand * per_row_bytes <= budget_bytes:
            return cand
    return 8


def _clamp_rows(tm, M):
    """Clamp the row tile: >=2 grid steps (megacore), ~8 steps when M is large."""
    tm = max(_SUBLANE, min(tm, _round_up(M, _SUBLANE)))
    if M > _SUBLANE:
        # Aim for ~8 steps, but never shrink tiles below 256 rows for DMA efficiency.
        tm = min(tm, max(256, _round_up(_cdiv(M, 8), _SUBLANE)))
        # Always at least 2 steps so both v7x TensorCores get work.
        tm = min(tm, _round_up(_cdiv(M, 2), _SUBLANE))
    return max(_SUBLANE, tm)


def _choose_tn(W):
    """Feature-axis tile: a multiple of 128 dividing W (<=1024) when possible."""
    if W <= 1024 or W % _LANE != 0:
        return W
    q = W // _LANE
    for t in range(8, 0, -1):
        if q % t == 0:
            return _LANE * t
    return _LANE


def _per_row_bytes_sincos(input_dim, half, x_bytes, out_bytes):
    d_pad = _round_up(input_dim, _LANE)
    h_pad = _round_up(half, _LANE)
    w_pad = _round_up(2 * half, _LANE)
    # 2x double-buffered x + 2x double-buffered out + ~6 f32 temporaries of width half.
    return 2 * d_pad * x_bytes + 2 * w_pad * out_bytes + 6 * h_pad * 4


def _per_row_bytes_phase(input_dim, tn, x_bytes, out_bytes):
    d_pad = _round_up(input_dim, _LANE)
    t_pad = _round_up(tn, _LANE)
    return 2 * d_pad * x_bytes + 2 * t_pad * out_bytes + 6 * t_pad * 4


# ------------------- fused sin/cos with shared range reduction ----------------
def _split_pio2():
    """pi/2 = HI + MID + LO, HI/MID with <=12 significant f32 mantissa bits, so
    k*HI and k*MID are exact for |k| < 4096 (Cody-Waite range reduction)."""
    rem = math.pi / 2.0
    parts = []
    for _ in range(2):
        c = np.array(rem, dtype=np.float32)
        c = (c.view(np.uint32) & np.uint32(0xFFFFF000)).view(np.float32)
        parts.append(float(c))
        rem -= float(c)
    parts.append(float(np.array(rem, dtype=np.float32)))
    return tuple(parts)


_PIO2_HI, _PIO2_MID, _PIO2_LO = _split_pio2()
_TWO_OVER_PI = 0.6366197723675814
# Minimax coefficients on [-pi/4, pi/4] (musl __sindf / __cosdf kernels).
_S1, _S2, _S3, _S4 = (-0.16666666641626524, 8.333329385889463e-3,
                      -1.9839334836096632e-4, 2.718311493989822e-6)
_C1, _C2, _C3, _C4 = (-0.499999997251031, 4.166662332373906e-2,
                      -1.388676377460993e-3, 2.439044879627741e-5)


def _sincos(xt):
    """sin(xt), cos(xt) sharing one Cody-Waite range reduction (VPU-only, f32).

    Accurate to a few f32 ulps for |xt| < ~6000 (|k| < 4096), which comfortably
    covers 2*pi*scale*(x@B) for typical Fourier-feature scales.
    """
    k = jnp.floor(xt * _TWO_OVER_PI + 0.5)
    r = ((xt - k * _PIO2_HI) - k * _PIO2_MID) - k * _PIO2_LO
    r2 = r * r
    sp = r * (1.0 + r2 * (_S1 + r2 * (_S2 + r2 * (_S3 + r2 * _S4))))
    cp = 1.0 + r2 * (_C1 + r2 * (_C2 + r2 * (_C3 + r2 * _C4)))
    ki = k.astype(jnp.int32)
    swap = (ki & 1) != 0                       # quadrants 1,3: swap sin<->cos
    flip_s = (ki & 2) != 0                     # quadrants 2,3: negate sin
    flip_c = jnp.logical_xor(flip_s, swap)     # quadrants 1,2: negate cos
    s_sel = jnp.where(swap, cp, sp)
    c_sel = jnp.where(swap, sp, cp)
    return jnp.where(flip_s, -s_sel, s_sel), jnp.where(flip_c, -c_sel, c_sel)


# ----------------------------- Pallas kernels ---------------------------------
def _make_sincos_kernel(half):
    def kernel(x_ref, b_ref, o_ref):
        # x_ref : (TM, input_dim)   b_ref : (input_dim, half)   o_ref : (TM, 2*half)
        x = x_ref[...].astype(jnp.float32)
        xt = jnp.dot(x, b_ref[...], preferred_element_type=jnp.float32)
        s, c = _sincos(xt)                     # shared range reduction
        o_ref[:, :half] = s.astype(o_ref.dtype)   # lane-dense (half % 128 == 0)
        o_ref[:, half:] = c.astype(o_ref.dtype)
    return kernel


def _phase_kernel(x_ref, b2_ref, phase_ref, o_ref):
    # x_ref : (TM, input_dim)   b2_ref : (input_dim, TN)   phase_ref : (1, TN)
    # o_ref : (TM, TN)   ->  sin(x@B2 + phase); cos folded in via the pi/2 phase.
    x = x_ref[...].astype(jnp.float32)
    xt = jnp.dot(x, b2_ref[...], preferred_element_type=jnp.float32) + phase_ref[...]
    o_ref[...] = jnp.sin(xt).astype(o_ref.dtype)


@functools.partial(jax.jit, static_argnames=("tm", "out_dtype", "vmem_limit"))
def _fourier_sincos(x_flat, b, *, tm, out_dtype, vmem_limit):
    M, input_dim = x_flat.shape
    _, half = b.shape
    out_bytes = jnp.dtype(out_dtype).itemsize
    cost = pl.CostEstimate(
        flops=2 * M * input_dim * half,
        transcendentals=2 * M * half,
        bytes_accessed=(M * input_dim * x_flat.dtype.itemsize
                        + input_dim * half * 4
                        + M * 2 * half * out_bytes),
    )
    return pl.pallas_call(
        _make_sincos_kernel(half),
        out_shape=jax.ShapeDtypeStruct((M, 2 * half), out_dtype),
        grid_spec=pltpu.PrefetchScalarGridSpec(
            num_scalar_prefetch=0,
            grid=(pl.cdiv(M, tm),),
            in_specs=[
                pl.BlockSpec((tm, input_dim), lambda i: (i, 0)),
                # Constant block index -> B stays VMEM-resident across the grid.
                pl.BlockSpec((input_dim, half), lambda i: (0, 0)),
            ],
            out_specs=pl.BlockSpec((tm, 2 * half), lambda i: (i, 0)),
        ),
        compiler_params=pltpu.CompilerParams(
            dimension_semantics=("parallel",),
            vmem_limit_bytes=vmem_limit,
        ),
        cost_estimate=cost,
    )(x_flat, b)


@functools.partial(jax.jit, static_argnames=("tm", "tn", "out_dtype", "vmem_limit"))
def _fourier_phase(x_flat, b2, phase, *, tm, tn, out_dtype, vmem_limit):
    M, input_dim = x_flat.shape
    _, W = b2.shape
    feat_steps = W // tn
    out_bytes = jnp.dtype(out_dtype).itemsize
    cost = pl.CostEstimate(
        flops=2 * M * input_dim * W,
        transcendentals=M * W,
        bytes_accessed=(M * input_dim * x_flat.dtype.itemsize * feat_steps
                        + input_dim * W * 4 + W * 4
                        + M * W * out_bytes),
    )
    return pl.pallas_call(
        _phase_kernel,
        out_shape=jax.ShapeDtypeStruct((M, W), out_dtype),
        grid_spec=pltpu.PrefetchScalarGridSpec(
            num_scalar_prefetch=0,
            grid=(pl.cdiv(M, tm), feat_steps),
            in_specs=[
                pl.BlockSpec((tm, input_dim), lambda i, j: (i, 0)),
                pl.BlockSpec((input_dim, tn), lambda i, j: (0, j)),
                pl.BlockSpec((1, tn), lambda i, j: (0, j)),
            ],
            out_specs=pl.BlockSpec((tm, tn), lambda i, j: (i, j)),
        ),
        compiler_params=pltpu.CompilerParams(
            dimension_semantics=("parallel", "parallel"),
            vmem_limit_bytes=vmem_limit,
        ),
        cost_estimate=cost,
    )(x_flat, b2, phase)


# ----------------------------- Module wrapper ---------------------------------
class GaussianFourierFeatureTransform:
    """JAX/Pallas port of the PyTorch module (deterministic init)."""

    def __init__(self, type, input_dim, mapping_dim, scale, key=None,
                 out_dtype=jnp.float32):
        assert type in ["no", "basic", "gauss"], "must define pre-processing"
        self.type = type
        self.input_dim = input_dim
        self.mapping_dim = self._get_mapping_dim(mapping_dim)
        self.scale = scale
        self.out_dtype = jnp.dtype(out_dtype)

        raw = self._get_preprocessing_param(key)
        if self.type != "no":
            assert self.mapping_dim % 2 == 0, "mapping_dim must be even"
            half = self.mapping_dim // 2
            # PyTorch-equivalent parameter (param * scale), kept for inspection.
            self.preprocessing_param = raw * self.scale
            # Kernel parameter: fold the forward's 2*pi in as well.
            bk = (self.preprocessing_param * (2.0 * math.pi)).astype(jnp.float32)
            self._b = bk                                           # (d, half)
            self._b2 = jnp.concatenate([bk, bk], axis=1)           # (d, 2*half)
            self._phase = jnp.concatenate(
                [jnp.zeros((1, half), jnp.float32),
                 jnp.full((1, half), math.pi / 2.0, jnp.float32)], axis=1)
        else:
            self.preprocessing_param = None
            self._b = self._b2 = self._phase = None

    def _get_mapping_dim(self, mapping_dim):
        if self.type == "no":
            return self.input_dim
        if self.type == "basic":
            return self.input_dim * 2
        return mapping_dim  # gauss

    def _get_preprocessing_param(self, key):
        if self.type == "gauss":
            if key is None:
                key = jax.random.PRNGKey(42)
            return jax.random.normal(
                key, (self.input_dim, self.mapping_dim // 2), dtype=jnp.float32)
        if self.type == "basic":
            return jnp.eye(self.input_dim, dtype=jnp.float32)
        return None  # 'no'

    def __call__(self, x):
        if self.type == "no":
            return x
        assert x.shape[-1] == self.input_dim
        leading = x.shape[:-1]
        x_flat = x.reshape(-1, self.input_dim)   # kernel promotes to f32 in VMEM
        M = x_flat.shape[0]
        half = self.mapping_dim // 2
        W = 2 * half
        budget, limit = _vmem_budget_and_limit()
        x_bytes = x_flat.dtype.itemsize
        o_bytes = self.out_dtype.itemsize

        use_sincos = False
        if half % _LANE == 0:
            per_row = _per_row_bytes_sincos(self.input_dim, half, x_bytes, o_bytes)
            fixed = 2 * _round_up(self.input_dim, _SUBLANE) * _round_up(half, _LANE) * 4
            cap = _vmem_cap_rows(per_row, fixed, budget)
            # Use the fused-sincos path unless the full-width out tile would force
            # tiny row tiles (then the feature-axis phase-fold path wins).
            use_sincos = cap >= min(256, _round_up(M, _SUBLANE))

        if use_sincos:
            tm = _clamp_rows(cap, M)
            out = _fourier_sincos(x_flat, self._b, tm=tm,
                                  out_dtype=self.out_dtype, vmem_limit=limit)
        else:
            tn = _choose_tn(W)
            per_row = _per_row_bytes_phase(self.input_dim, tn, x_bytes, o_bytes)
            fixed = (2 * _round_up(self.input_dim, _SUBLANE) * _round_up(tn, _LANE) * 4
                     + 2 * _SUBLANE * _round_up(tn, _LANE) * 4)
            cap = _vmem_cap_rows(per_row, fixed, budget)
            tm = _clamp_rows(cap, M)
            out = _fourier_phase(x_flat, self._b2, self._phase, tm=tm, tn=tn,
                                 out_dtype=self.out_dtype, vmem_limit=limit)
        return out.reshape(*leading, self.mapping_dim)


# --------------------------------- main ---------------------------------------
if __name__ == "__main__":
    key = jax.random.PRNGKey(0)
    k_x, k_param = jax.random.split(key)

    batch, seq, input_dim, scale = 2, 64, 4, 10.0
    x = jax.random.uniform(k_x, (batch, seq, input_dim), dtype=jnp.float32)

    def reference(x_in, module):
        xt = 2.0 * math.pi * (x_in @ module.preprocessing_param)
        return jnp.concatenate([jnp.sin(xt), jnp.cos(xt)], axis=-1)

    # 1) gauss, mapping_dim=256 (half=128 -> fused-sincos lane-dense path, 2 grid steps)
    mod_g = GaussianFourierFeatureTransform("gauss", input_dim, 256, scale, key=k_param)
    out_g = jax.block_until_ready(mod_g(x))
    assert out_g.shape == (batch, seq, 256), out_g.shape
    assert jnp.allclose(out_g, reference(x, mod_g), atol=1e-4, rtol=1e-4), "gauss-256 mismatch"

    # 2) gauss, mapping_dim=128 (half=64 -> phase-fold, single lane-dense 128-wide store)
    mod_s = GaussianFourierFeatureTransform("gauss", input_dim, 128, scale, key=k_param)
    out_s = jax.block_until_ready(mod_s(x))
    assert out_s.shape == (batch, seq, 128), out_s.shape
    assert jnp.allclose(out_s, reference(x, mod_s), atol=1e-4, rtol=1e-4), "gauss-128 mismatch"

    # 3) gauss, mapping_dim=1152 (half=576 not %128 -> phase-fold with 3-step feature grid)
    mod_w = GaussianFourierFeatureTransform("gauss", input_dim, 1152, scale, key=k_param)
    out_w = jax.block_until_ready(mod_w(x))
    assert out_w.shape == (batch, seq, 1152), out_w.shape
    assert jnp.allclose(out_w, reference(x, mod_w), atol=1e-4, rtol=1e-4), "gauss-1152 mismatch"

    # 4) basic (half = input_dim, tiny lane-sparse output; correctness path)
    mod_b = GaussianFourierFeatureTransform("basic", input_dim, 0, scale)
    out_b = jax.block_until_ready(mod_b(x))
    assert out_b.shape == (batch, seq, 2 * input_dim), out_b.shape
    assert jnp.allclose(out_b, reference(x, mod_b), atol=1e-4, rtol=1e-4), "basic mismatch"

    # 5) row count not a multiple of 8/128 (exercises padded/masked edge blocks)
    x_odd = jax.random.uniform(k_x, (3, 37, input_dim), dtype=jnp.float32)
    out_o = jax.block_until_ready(mod_g(x_odd))
    assert out_o.shape == (3, 37, 256), out_o.shape
    assert jnp.allclose(out_o, reference(x_odd, mod_g), atol=1e-4, rtol=1e-4), "odd-M mismatch"

    # 6) bf16 output (halves HBM writeback on the write-bound v5e path)
    mod_h = GaussianFourierFeatureTransform("gauss", input_dim, 256, scale, key=k_param,
                                            out_dtype=jnp.bfloat16)
    out_h = jax.block_until_ready(mod_h(x))
    assert out_h.dtype == jnp.bfloat16
    assert jnp.allclose(out_h.astype(jnp.float32), reference(x, mod_h),
                        atol=1e-2, rtol=1e-2), "bf16 mismatch"

    print("KERNEL_OK")
</pallas_src>

<mosaic_0001>
module attributes {stable_mosaic.version = 11 : i64} {
  func.func @kernel(%arg0: i32, %arg1: memref<64x4xf32, #tpu.memory_space<vmem>>, %arg2: memref<4x128xf32, #tpu.memory_space<vmem>>, %arg3: memref<64x256xf32, #tpu.memory_space<vmem>>) attributes {dimension_semantics = [#tpu.dimension_semantics<parallel>], iteration_bounds = array<i64: 2>, scalar_prefetch = 0 : i64, scratch_operands = 0 : i64, tpu.core_type = #tpu.core_type<tc>, window_params = [{transform_indices = @transform_0, window_bounds = array<i64: 64, 4>}, {pipeline_mode = #tpu.pipeline_mode<synchronous>, transform_indices = @transform_1, window_bounds = array<i64: 4, 128>}, {transform_indices = @transform_2, window_bounds = array<i64: 64, 256>}]} {
    %c0 = arith.constant 0 : index
    %c0_0 = arith.constant 0 : index
    %0 = vector.load %arg1[%c0, %c0_0] : memref<64x4xf32, #tpu.memory_space<vmem>>, vector<64x4xf32>
    %c0_1 = arith.constant 0 : index
    %c0_2 = arith.constant 0 : index
    %1 = vector.load %arg2[%c0_1, %c0_2] : memref<4x128xf32, #tpu.memory_space<vmem>>, vector<4x128xf32>
    %cst = arith.constant dense<0.000000e+00> : vector<64x128xf32>
    %2 = tpu.matmul %0, %1, %cst {dimension_numbers = #tpu.dot_dimension_numbers<[1], [0], [0], [1], [0, 0, 1, 1], [], []>} : vector<64x4xf32>, vector<4x128xf32>, vector<64x128xf32> -> vector<64x128xf32>
    %cst_3 = arith.constant 0.636619746 : f32
    %3 = vector.broadcast %cst_3 : f32 to vector<64x128xf32>
    %4 = arith.mulf %2, %3 : vector<64x128xf32>
    %cst_4 = arith.constant 5.000000e-01 : f32
    %5 = vector.broadcast %cst_4 : f32 to vector<64x128xf32>
    %6 = arith.addf %4, %5 : vector<64x128xf32>
    %7 = math.floor %6 : vector<64x128xf32>
    %cst_5 = arith.constant 1.5703125 : f32
    %8 = vector.broadcast %cst_5 : f32 to vector<64x128xf32>
    %9 = arith.mulf %7, %8 : vector<64x128xf32>
    %10 = arith.subf %2, %9 : vector<64x128xf32>
    %cst_6 = arith.constant 4.83751297E-4 : f32
    %11 = vector.broadcast %cst_6 : f32 to vector<64x128xf32>
    %12 = arith.mulf %7, %11 : vector<64x128xf32>
    %13 = arith.subf %10, %12 : vector<64x128xf32>
    %cst_7 = arith.constant 7.549790e-08 : f32
    %14 = vector.broadcast %cst_7 : f32 to vector<64x128xf32>
    %15 = arith.mulf %7, %14 : vector<64x128xf32>
    %16 = arith.subf %13, %15 : vector<64x128xf32>
    %17 = arith.mulf %16, %16 : vector<64x128xf32>
    %cst_8 = arith.constant 2.71831141E-6 : f32
    %18 = vector.broadcast %cst_8 : f32 to vector<64x128xf32>
    %19 = arith.mulf %17, %18 : vector<64x128xf32>
    %cst_9 = arith.constant -1.98393347E-4 : f32
    %20 = vector.broadcast %cst_9 : f32 to vector<64x128xf32>
    %21 = arith.addf %20, %19 : vector<64x128xf32>
    %22 = arith.mulf %17, %21 : vector<64x128xf32>
    %cst_10 = arith.constant 0.00833332911 : f32
    %23 = vector.broadcast %cst_10 : f32 to vector<64x128xf32>
    %24 = arith.addf %23, %22 : vector<64x128xf32>
    %25 = arith.mulf %17, %24 : vector<64x128xf32>
    %cst_11 = arith.constant -0.166666672 : f32
    %26 = vector.broadcast %cst_11 : f32 to vector<64x128xf32>
    %27 = arith.addf %26, %25 : vector<64x128xf32>
    %28 = arith.mulf %17, %27 : vector<64x128xf32>
    %cst_12 = arith.constant 1.000000e+00 : f32
    %29 = vector.broadcast %cst_12 : f32 to vector<64x128xf32>
    %30 = arith.addf %29, %28 : vector<64x128xf32>
    %31 = arith.mulf %16, %30 : vector<64x128xf32>
    %cst_13 = arith.constant 2.43904487E-5 : f32
    %32 = vector.broadcast %cst_13 : f32 to vector<64x128xf32>
    %33 = arith.mulf %17, %32 : vector<64x128xf32>
    %cst_14 = arith.constant -0.00138867635 : f32
    %34 = vector.broadcast %cst_14 : f32 to vector<64x128xf32>
    %35 = arith.addf %34, %33 : vector<64x128xf32>
    %36 = arith.mulf %17, %35 : vector<64x128xf32>
    %cst_15 = arith.constant 0.0416666232 : f32
    %37 = vector.broadcast %cst_15 : f32 to vector<64x128xf32>
    %38 = arith.addf %37, %36 : vector<64x128xf32>
    %39 = arith.mulf %17, %38 : vector<64x128xf32>
    %cst_16 = arith.constant -5.000000e-01 : f32
    %40 = vector.broadcast %cst_16 : f32 to vector<64x128xf32>
    %41 = arith.addf %40, %39 : vector<64x128xf32>
    %42 = arith.mulf %17, %41 : vector<64x128xf32>
    %cst_17 = arith.constant 1.000000e+00 : f32
    %43 = vector.broadcast %cst_17 : f32 to vector<64x128xf32>
    %44 = arith.addf %43, %42 : vector<64x128xf32>
    %45 = arith.fptosi %7 : vector<64x128xf32> to vector<64x128xi32>
    %c1_i32 = arith.constant 1 : i32
    %46 = vector.broadcast %c1_i32 : i32 to vector<64x128xi32>
    %47 = arith.andi %45, %46 : vector<64x128xi32>
    %c0_i32 = arith.constant 0 : i32
    %48 = vector.broadcast %c0_i32 : i32 to vector<64x128xi32>
    %49 = arith.cmpi ne, %47, %48 : vector<64x128xi32>
    %c2_i32 = arith.constant 2 : i32
    %50 = vector.broadcast %c2_i32 : i32 to vector<64x128xi32>
    %51 = arith.andi %45, %50 : vector<64x128xi32>
    %c0_i32_18 = arith.constant 0 : i32
    %52 = vector.broadcast %c0_i32_18 : i32 to vector<64x128xi32>
    %53 = arith.cmpi ne, %51, %52 : vector<64x128xi32>
    %54 = arith.xori %53, %49 : vector<64x128xi1>
    %55 = arith.select %49, %44, %31 : vector<64x128xi1>, vector<64x128xf32>
    %56 = arith.select %49, %31, %44 : vector<64x128xi1>, vector<64x128xf32>
    %cst_19 = arith.constant 0.000000e+00 : f32
    %57 = vector.broadcast %cst_19 : f32 to vector<64x128xf32>
    %58 = arith.subf %57, %55 : vector<64x128xf32>
    %59 = arith.select %53, %58, %55 : vector<64x128xi1>, vector<64x128xf32>
    %cst_20 = arith.constant 0.000000e+00 : f32
    %60 = vector.broadcast %cst_20 : f32 to vector<64x128xf32>
    %61 = arith.subf %60, %56 : vector<64x128xf32>
    %62 = arith.select %54, %61, %56 : vector<64x128xi1>, vector<64x128xf32>
    %c0_21 = arith.constant 0 : index
    %c0_22 = arith.constant 0 : index
    %63 = vector.load %arg3[%c0_21, %c0_22] : memref<64x256xf32, #tpu.memory_space<vmem>>, vector<64x128xf32>
    tpu.vector_store %arg3[%c0_21, %c0_22], %59 {strides = array<i32>} : memref<64x256xf32, #tpu.memory_space<vmem>>, vector<64x128xf32>,
    %c0_23 = arith.constant 0 : index
    %c128 = arith.constant 128 : index
    %64 = vector.load %arg3[%c0_23, %c128] : memref<64x256xf32, #tpu.memory_space<vmem>>, vector<64x128xf32>
    tpu.vector_store %arg3[%c0_23, %c128], %62 {strides = array<i32>} : memref<64x256xf32, #tpu.memory_space<vmem>>, vector<64x128xf32>,
    return
  }
  func.func @transform_0(%arg0: i32) -> (i32, i32) {
    %c0_i32 = arith.constant 0 : i32
    %c0_i32_0 = arith.constant 0 : i32
    return %arg0, %c0_i32 : i32, i32
  }
  func.func @transform_1(%arg0: i32) -> (i32, i32) {
    %c0_i32 = arith.constant 0 : i32
    %c0_i32_0 = arith.constant 0 : i32
    %c0_i32_1 = arith.constant 0 : i32
    return %c0_i32, %c0_i32_0 : i32, i32
  }
  func.func @transform_2(%arg0: i32) -> (i32, i32) {
    %c0_i32 = arith.constant 0 : i32
    %c0_i32_0 = arith.constant 0 : i32
    return %arg0, %c0_i32 : i32, i32
  }
}

</mosaic_0001>

<bundles_post_ra>
// kernel: _fourier_sincos.1
= control target key start
LH: loop header
LB: loop body
LE: loop exit
PB: predicated region body
PF: predicated region fallthrough
CT: control target
= control target key end

     0   :  { %7 = vsyncpa [#allocation3], 0  ;;  %s1099_s0 = inlined_call_operand.vmem [shape: f32[128,4], index: 0, kind: input, shape index: {}]   ;;  %s1100_s1 = inlined_call_operand.vmem [shape: f32[4,128], index: 1, kind: input, shape index: {}]   ;;  %s1101_s2 = inlined_call_operand.hbm [shape: f32[128,256], index: 2, kind: output, shape index: {}]  }
   0x1   :  { %9 = vsyncpa [#allocation3 + $0x1], 0  ;;  %s796_s9 = smov 0   ;;  %s798_s10 = smov 0  }
   0x2   :  { %s800_s11 = smov 0   ;;  %s802_s12 = smov 0  }
   0x3 LB: > { %s817_s13 = sadd.s32 4294967295, %s777_s12   ;;  %s631_s14 = sadd.s32 4294967294, %s777_s12   ;;  %s777_s12 = sphi %s802_s12, %s1107_s12   ;;  %s773_s11 = sphi %s800_s11, %s1106_s11   ;;  %s769_s10 = sphi %s798_s10, %s1105_s10   ;;  %s765_s9 = sphi %s796_s9, %s1104_s9  }
   0x4   : > { %s821_s15 = sadd.s32 1, %s777_s12   ;;  %s69_s16 = sadd.s32 1, %s773_s11 }
   0x5   : > { %s66_s17 = ssub.s32 %s777_s12, %s821_s15  ;;  %p79_p0 = scmp.ne.s32.totalorder %s773_s11, %s769_s10 }
   0x6   : > { %p67_p1 = scmp.eq.s32.totalorder %s66_s17, 0  ;;  %p80_p2 = scmp.eq.s32.totalorder %s817_s13, 1 }
   0x7   : > { %p85_p3 = scmp.ne.s32.totalorder %s769_s10, %s765_s9  ;;  %p86_p4 = scmp.eq.s32.totalorder %s631_s14, 1 }
   0x8   : > { %s832_s18 = scalar_select %p67_p1, %s773_s11, %s69_s16  }
   0x9   : > { %p834_p5 = por %p80_p2, %p79_p0  ;;  %p838_p6 = por %p86_p4, %p85_p3 }
   0xa   : > { %p634_p7 = scmp.ge.s32.totalorder %s777_s12, 1  ;;  %p116_p8 = scmp.lt.s32.totalorder %s777_s12, 3 }
   0xc   : > { %p117_p9 = pnand %p634_p7, %p116_p8 }
   0xd   : > { %s636_s23 = sshll.u32 (!%p117_p9), %s817_s13, 3  ;;  %s135_s28 = sand.u32 (!%p117_p9), 1, %s769_s10  }
   0xe   : > { %120 = sbr.rel (%p117_p9) target bundleno = 244 (0xf4), region = 28  ;;  %p139_p10 = scmp.lt.s32.totalorder (!%p117_p9), %s636_s23, 15 }
   0xf   : > { %s635_s29 = sshll.u32 (!%p117_p9), %s135_s28, 7  ;;  %s654_s3 = sshll.u32 (!%p117_p9), %s817_s13, 7 }
  0x10   : > { %s959_s30 = scalar_lea.vmem (!%p117_p9), [#allocation2], %s635_s29  ;;  %s565_s6 = scalar_lea.hbm (!%p117_p9), %s1101_s2, %s654_s3 }
  0x11   : > { %s566_s7 = sshll.u32 (!%p117_p9), %s959_s30, 4  ;;  %s568_s8 = sshll.u32 (!%p117_p9), %s565_s6, 4  ;;  %s567_s7 = int_to_ptr.vmem [resolvable:$true] %s566_s7  ;;  %s569_s8 = int_to_ptr.hbm [resolvable:$true] %s568_s8 }
  0x12   : > { %s553_s13 = scalar_lea.sflag (!%p117_p9), [#allocation3], %s135_s28  ;;  %s729_s14 = sshra.s32 (!%p117_p9), %s569_s8, 4  ;;  %s730_s14 = int_to_ptr.hbm [resolvable:$true] %s729_s14 }
  0x13   : > { %v153_v0 = vld [vmem:[%s1100_s1] sm:$0xf]  ;;  %vm179_vm0 = vcmask 1043456   ;;  %s1109_s23 = smov (!%p139_p10, %s636_s23), 15  ;;  %vm154_vm1 = vcmask 31744   ;;  %s731_s16 = scalar_lea.hbm %s730_s14, 128 }
  0x14   : > { %638 = vmatpush.msk.msra.mxu0 %vm179_vm0, %v153_v0  ;;  %655 = vmatpush.msk.msra.mxu1 %vm179_vm0, %v153_v0  ;;  %s637_s24 = sshll.u32 %s1109_s23, 3  ;;  %p732_p11 = scmp.ne.s32.totalorder %s730_s14, %s731_s16 }
  0x15   : > { %656 = vmatpush.msk.msra.mxu2 %vm179_vm0, %v153_v0  ;;  %657 = vmatpush.msk.msra.mxu3 %vm179_vm0, %v153_v0  ;;  %s142_s27 = scalar_lea.vmem %s1099_s0, %s637_s24  ;;  %s735_s22 = scalar_lea.hbm %s1101_s2, 256 }
  0x16   : > { %v145_v1 = vld [vmem:[%s142_s27] sm:$0xff]  ;;  %v147_v2 = vld [vmem:[%s142_s27 + $0x10] sm:$0xff]  ;;  %v146_v5 = vld [vmem:[%s142_s27 + $0x8] sm:$0xff]  ;;  %p733_p12 = pnand %p732_p11, %p834_p5  ;;  %p736_p0 = scmp.lt.s32.totalorder %s730_s14, %s1101_s2 }
  0x17   : > { %v149_v3 = vld [vmem:[%s142_s27 + $0x20] sm:$0xff]  ;;  %639 = vmatmul.msk.f32.vlgmr.msra.gmra.mxu0 %vm154_vm1, %v145_v1  ;;  %641 = vmatmul.msk.f32.vlgmr.msra.gmra.mxu1 %vm154_vm1, %v147_v2  ;;  %v151_v4 = vld [vmem:[%s142_s27 + $0x30] sm:$0xff]  ;;  %v148_v6 = vld [vmem:[%s142_s27 + $0x18] sm:$0xff]  ;;  %p737_p1 = scmp.lt.s32.totalorder %s735_s22, %s731_s16 }
  0x18   : > { %643 = vmatmul.msk.f32.vlgmr.msra.gmra.mxu2 %vm154_vm1, %v149_v3  ;;  %645 = vmatmul.msk.f32.vlgmr.msra.gmra.mxu3 %vm154_vm1, %v151_v4  ;;  %v150_v7 = vld [vmem:[%s142_s27 + $0x28] sm:$0xff]  ;;  %v152_v8 = vld [vmem:[%s142_s27 + $0x38] sm:$0xff]  ;;  %p734_p13 = pneg %p733_p12 }
  0x19   : > { %p738_p2 = por %p737_p1, %p736_p0 }
  0x1b   : > { %p739_p3 = pnand %p738_p2, %p734_p13 }
  0x1f   : > { %640 = vmatmul.msk.f32.gmra.mxu0 %vm154_vm1, %v146_v5  ;;  %642 = vmatmul.msk.f32.gmra.mxu1 %vm154_vm1, %v148_v6 }
  0x20   : > { %644 = vmatmul.msk.f32.gmra.mxu2 %vm154_vm1, %v150_v7  ;;  %646 = vmatmul.msk.f32.gmra.mxu3 %vm154_vm1, %v152_v8 }
  0x94   : > { %v200_v9 = vpop.f32.mrf.mxu0  ;;  %v206_v10 = vpop.f32.mrf.mxu1 }
  0x95   : > { %v224_v11 = vmul.f32 0.63661975, %v200_v9  ;;  %v226_v12 = vmul.f32 0.63661975, %v206_v10 }
  0x97   : > { %v232_v13 = vadd.f32 0.5, %v224_v11  ;;  %v234_v14 = vadd.f32 0.5, %v226_v12 }
  0x99   : > { %v240_v15 = vfloor.f32 %v232_v13  ;;  %v242_v16 = vfloor.f32 %v234_v14 }
  0x9b   : > { %v248_v17 = vmul.f32 1.5703125, %v240_v15  ;;  %v264_v18 = vmul.f32 0.0004837513, %v240_v15  ;;  %v212_v19 = vpop.f32.mrf.mxu2  ;;  %v218_v20 = vpop.f32.mrf.mxu3  ;;  %v250_v21 = vmul.f32 1.5703125, %v242_v16  ;;  %v266_v22 = vmul.f32 0.0004837513, %v242_v16 }
  0x9c   : > { %v280_v24 = vmul.f32 7.54979e-08, %v240_v15  ;;  %v228_v25 = vmul.f32 0.63661975, %v212_v19  ;;  %v282_v27 = vmul.f32 7.54979e-08, %v242_v16  ;;  %v659_v30 = vcvt.f32.s32 %v240_v15  ;;  %v861_v36 = vpop.f32.mrf.mxu0  ;;  %v884_v60 = vpop.f32.mrf.mxu1 }
  0x9d   : > { %v256_v23 = vsub.f32 %v200_v9, %v248_v17  ;;  %v258_v26 = vsub.f32 %v206_v10, %v250_v21  ;;  %v230_v28 = vmul.f32 0.63661975, %v218_v20  ;;  %v663_v38 = vcvt.f32.s32 %v242_v16 }
  0x9e   : > { %v236_v31 = vadd.f32 0.5, %v228_v25  ;;  %v869_v41 = vand.u32 1, %v659_v30  ;;  %v871_v42 = vand.u32 2, %v659_v30  ;;  %v225_v47 = vmul.f32 0.63661975, %v861_v36 }
  0x9f   : > { %v272_v29 = vsub.f32 %v256_v23, %v264_v18  ;;  %v274_v32 = vsub.f32 %v258_v26, %v266_v22  ;;  %v238_v33 = vadd.f32 0.5, %v230_v28  ;;  %v881_v54 = vand.u32 1, %v663_v38 }
  0xa0   : > { %v244_v35 = vfloor.f32 %v236_v31  ;;  %v891_v7 = vand.u32 2, %v663_v38  ;;  %v894_v8 = vmul.f32 0.63661975, %v884_v60  ;;  %v233_v16 = vadd.f32 0.5, %v225_v47 }
  0xa1   : > { %v859_v34 = vsub.f32 %v272_v29, %v280_v24  ;;  %v863_v37 = vsub.f32 %v274_v32, %v282_v27  ;;  %v865_v39 = vfloor.f32 %v238_v33  ;;  %vm456_vm2 = vcmp.ne.s32.totalorder %v869_v41, 0 }
  0xa2   : > { %v252_v43 = vmul.f32 1.5703125, %v244_v35  ;;  %v268_v45 = vmul.f32 0.0004837513, %v244_v35  ;;  %v284_v51 = vmul.f32 7.54979e-08, %v244_v35  ;;  %v667_v63 = vcvt.f32.s32 %v244_v35 }
  0xa3   : > { %v296_v40 = vmul.f32 %v859_v34, %v859_v34  ;;  %v875_v44 = vmul.f32 %v863_v37, %v863_v37  ;;  %v254_v46 = vmul.f32 1.5703125, %v865_v39  ;;  %v270_v55 = vmul.f32 0.0004837513, %v865_v39 }
  0xa4   : > { %v260_v50 = vsub.f32 %v212_v19, %v252_v43  ;;  %v286_v0 = vmul.f32 7.54979e-08, %v865_v39  ;;  %v902_v15 = vand.u32 1, %v667_v63  ;;  %vm472_vm3 = vcmp.ne.s32.totalorder %v871_v42, 0 }
  0xa5   : > { %v304_v48 = vmul.f32 2.7183114e-06, %v296_v40  ;;  %v376_v49 = vmul.f32 2.4390449e-05, %v296_v40  ;;  %v306_v52 = vmul.f32 2.7183114e-06, %v875_v44  ;;  %v262_v59 = vsub.f32 %v218_v20, %v254_v46  ;;  %vm480_vm7 = vmxor %vm472_vm3, %vm456_vm2 }
  0xa6   : > { %v378_v53 = vmul.f32 2.4390449e-05, %v875_v44  ;;  %v276_v58 = vsub.f32 %v260_v50, %v268_v45  ;;  %v910_v23 = vand.u32 2, %v667_v63  ;;  %vm458_vm4 = vcmp.ne.s32.totalorder %v881_v54, 0 }
  0xa7   : > { %v312_v56 = vadd.f32 -0.00019839335, %v304_v48  ;;  %v384_v57 = vadd.f32 -0.0013886763, %v376_v49  ;;  %v314_v61 = vadd.f32 -0.00019839335, %v306_v52  ;;  %v278_v4 = vsub.f32 %v262_v59, %v270_v55 }
  0xa8   : > { %v386_v62 = vadd.f32 -0.0013886763, %v378_v53  ;;  %v887_v3 = vsub.f32 %v276_v58, %v284_v51  ;;  %vm474_vm5 = vcmp.ne.s32.totalorder %v891_v7, 0  ;;  %v671_v28 = vcvt.f32.s32 %v865_v39 }
  0xa9   : > { %v320_v1 = vmul.f32 %v312_v56, %v296_v40  ;;  %v392_v2 = vmul.f32 %v384_v57, %v296_v40  ;;  %v322_v5 = vmul.f32 %v314_v61, %v875_v44  ;;  %v900_v12 = vsub.f32 %v278_v4, %v286_v0  ;;  %vm482_vm8 = vmxor %vm474_vm5, %vm458_vm4 }
  0xaa   : > { %v394_v6 = vmul.f32 %v386_v62, %v875_v44  ;;  %v898_v11 = vmul.f32 %v887_v3, %v887_v3  ;;  %v919_v32 = vfloor.f32 %v233_v16  ;;  %vm460_vm6 = vcmp.ne.s32.totalorder %v902_v15, 0 }
  0xab   : > { %v328_v9 = vadd.f32 0.008333329, %v320_v1  ;;  %v400_v10 = vadd.f32 0.041666623, %v392_v2  ;;  %v330_v13 = vadd.f32 0.008333329, %v322_v5  ;;  %v914_v24 = vmul.f32 %v900_v12, %v900_v12 }
  0xac   : > { %v402_v14 = vadd.f32 0.041666623, %v394_v6  ;;  %v308_v19 = vmul.f32 2.7183114e-06, %v898_v11  ;;  %v380_v20 = vmul.f32 2.4390449e-05, %v898_v11 }
  0xad   : > { %v336_v17 = vmul.f32 %v328_v9, %v296_v40  ;;  %v408_v18 = vmul.f32 %v400_v10, %v296_v40  ;;  %v338_v21 = vmul.f32 %v330_v13, %v875_v44  ;;  %v310_v43 = vmul.f32 2.7183114e-06, %v914_v24 }
  0xae   : > { %v410_v22 = vmul.f32 %v402_v14, %v875_v44  ;;  %v316_v27 = vadd.f32 -0.00019839335, %v308_v19  ;;  %v388_v31 = vadd.f32 -0.0013886763, %v380_v20  ;;  %v382_v48 = vmul.f32 2.4390449e-05, %v914_v24 }
  0xaf   : > { %v344_v25 = vadd.f32 -0.16666667, %v336_v17  ;;  %v416_v26 = vadd.f32 -0.5, %v408_v18  ;;  %v346_v29 = vadd.f32 -0.16666667, %v338_v21  ;;  %v249_v59 = vmul.f32 1.5703125, %v919_v32 }
  0xb0   : > { %v418_v30 = vadd.f32 -0.5, %v410_v22  ;;  %v324_v38 = vmul.f32 %v316_v27, %v898_v11  ;;  %v396_v47 = vmul.f32 %v388_v31, %v898_v11  ;;  %v318_v52 = vadd.f32 -0.00019839335, %v310_v43  ;;  %v969_v27 = vpop.f32.mrf.mxu2 }
  0xb1   : > { %v352_v33 = vmul.f32 %v344_v25, %v296_v40  ;;  %v424_v35 = vmul.f32 %v416_v26, %v296_v40  ;;  %v354_v45 = vmul.f32 %v346_v29, %v875_v44  ;;  %v390_v56 = vadd.f32 -0.0013886763, %v382_v48 }
  0xb2   : > { %v426_v46 = vmul.f32 %v418_v30, %v875_v44  ;;  %v332_v51 = vadd.f32 0.008333329, %v324_v38  ;;  %v404_v55 = vadd.f32 0.041666623, %v396_v47  ;;  %v326_v44 = vmul.f32 %v318_v52, %v914_v24 }
  0xb3   : > { %v360_v49 = vadd.f32 1.0, %v352_v33  ;;  %v432_v50 = vadd.f32 1.0, %v424_v35  ;;  %v362_v53 = vadd.f32 1.0, %v354_v45  ;;  %v398_v63 = vmul.f32 %v390_v56, %v914_v24 }
  0xb4   : > { %v434_v40 = vadd.f32 1.0, %v426_v46  ;;  %v340_v58 = vmul.f32 %v332_v51, %v898_v11  ;;  %v412_v62 = vmul.f32 %v404_v55, %v898_v11  ;;  %v265_v0 = vmul.f32 0.0004837513, %v919_v32 }
  0xb5   : > { %v368_v57 = vmul.f32 %v360_v49, %v859_v34  ;;  %v370_v61 = vmul.f32 %v362_v53, %v863_v37  ;;  %v334_v4 = vadd.f32 0.008333329, %v326_v44  ;;  %v406_v41 = vadd.f32 0.041666623, %v398_v63 }
  0xb6   : > { %v348_v2 = vadd.f32 -0.16666667, %v340_v58  ;;  %v420_v16 = vadd.f32 -0.5, %v412_v62  ;;  %vm476_vm9 = vcmp.ne.s32.totalorder %v910_v23, 0  ;;  %v257_v26 = vsub.f32 %v861_v36, %v249_v59 }
  0xb7   : > { %v488_v1 = vsel %vm456_vm2, %v432_v50, %v368_v57  ;;  %v496_v34 = vsel %vm456_vm2, %v368_v57, %v432_v50  ;;  %v490_v37 = vsel %vm458_vm4, %v434_v40, %v370_v61  ;;  %v498_v9 = vsel %vm458_vm4, %v370_v61, %v434_v40  ;;  %vm484_vm10 = vmxor %vm476_vm9, %vm460_vm6 }
  0xb8   : > { %v504_v5 = vsub.f32 0.0, %v488_v1  ;;  %v520_v6 = vsub.f32 0.0, %v496_v34  ;;  %v506_v10 = vsub.f32 0.0, %v490_v37  ;;  %v522_v13 = vsub.f32 0.0, %v498_v9 }
  0xb9   : > { %v356_v14 = vmul.f32 %v348_v2, %v898_v11  ;;  %v342_v19 = vmul.f32 %v334_v4, %v914_v24  ;;  %v428_v54 = vmul.f32 %v420_v16, %v898_v11  ;;  %v414_v25 = vmul.f32 %v406_v41, %v914_v24  ;;  %v221_v2 = vpop.f32.mrf.mxu3 }
  0xba   : > { %v512_v17 = vsel %vm472_vm3, %v504_v5, %v488_v1  ;;  %v528_v18 = vsel %vm480_vm7, %v520_v6, %v496_v34  ;;  %v514_v42 = vsel %vm474_vm5, %v506_v10, %v490_v37  ;;  %v530_v20 = vsel %vm482_vm8, %v522_v13, %v498_v9 }
  0xbb   : > { %536 = vst [vmem:[%s959_s30] sm:$0xff] %v512_v17  ;;  %v364_v21 = vadd.f32 1.0, %v356_v14  ;;  %v350_v22 = vadd.f32 -0.16666667, %v342_v19  ;;  %v436_v7 = vadd.f32 1.0, %v428_v54  ;;  %v281_v30 = vmul.f32 7.54979e-08, %v919_v32 }
  0xbc   : > { %544 = vst [vmem:[%s959_s30 + $0x8] sm:$0xff] %v528_v18  ;;  %v235_v31 = vadd.f32 0.5, %v894_v8  ;;  %v422_v33 = vadd.f32 -0.5, %v414_v25  ;;  %v454_v35 = vand.u32 1, %v671_v28  ;;  %v273_v38 = vsub.f32 %v257_v26, %v265_v0 }
  0xbd   : > { %538 = vst [vmem:[%s959_s30 + $0x20] sm:$0xff] %v514_v42  ;;  %v372_v29 = vmul.f32 %v364_v21, %v887_v3  ;;  %v358_v11 = vmul.f32 %v350_v22, %v914_v24  ;;  %v470_v43 = vand.u32 2, %v671_v28  ;;  %v229_v8 = vmul.f32 0.63661975, %v969_v27 }
  0xbe   : > { %546 = vst [vmem:[%s959_s30 + $0x28] sm:$0xff] %v530_v20  ;;  %v430_v48 = vmul.f32 %v422_v33, %v914_v24  ;;  %v991_v49 = vsub.f32 %v273_v38, %v281_v30  ;;  %v993_v50 = vfloor.f32 %v235_v31  ;;  %vm462_vm11 = vcmp.ne.s32.totalorder %v454_v35, 0 }
  0xbf   : > { %v492_v36 = vsel %vm460_vm6, %v436_v7, %v372_v29  ;;  %v500_v3 = vsel %vm460_vm6, %v372_v29, %v436_v7  ;;  %v366_v47 = vadd.f32 1.0, %v358_v11  ;;  %vm478_vm12 = vcmp.ne.s32.totalorder %v470_v43, 0 }
  0xc0   : > { %v508_v45 = vsub.f32 0.0, %v492_v36  ;;  %v524_v46 = vsub.f32 0.0, %v500_v3  ;;  %v438_v52 = vadd.f32 1.0, %v430_v48  ;;  %v297_v15 = vmul.f32 %v991_v49, %v991_v49  ;;  %vm486_vm13 = vmxor %vm478_vm12, %vm462_vm11 }
  0xc1   : > { %v374_v51 = vmul.f32 %v366_v47, %v900_v12  ;;  %v251_v24 = vmul.f32 1.5703125, %v993_v50  ;;  %v267_v55 = vmul.f32 0.0004837513, %v993_v50  ;;  %v237_v23 = vadd.f32 0.5, %v229_v8 }
  0xc2   : > { %v516_v39 = vsel %vm476_vm9, %v508_v45, %v492_v36  ;;  %v532_v28 = vsel %vm484_vm10, %v524_v46, %v500_v3  ;;  %v305_v12 = vmul.f32 2.7183114e-06, %v297_v15  ;;  %v377_v58 = vmul.f32 2.4390449e-05, %v297_v15 }
  0xc3   : > { %540 = vst [vmem:[%s959_s30 + $0x40] sm:$0xff] %v516_v39  ;;  %v494_v53 = vsel %vm462_vm11, %v438_v52, %v374_v51  ;;  %v502_v40 = vsel %vm462_vm11, %v374_v51, %v438_v52  ;;  %v661_v44 = vcvt.f32.s32 %v919_v32  ;;  %v259_v59 = vsub.f32 %v884_v60, %v251_v24 }
  0xc4   : > { %548 = vst [vmem:[%s959_s30 + $0x48] sm:$0xff] %v532_v28  ;;  %v510_v56 = vsub.f32 0.0, %v494_v53  ;;  %v526_v57 = vsub.f32 0.0, %v502_v40  ;;  %v283_v61 = vmul.f32 7.54979e-08, %v993_v50  ;;  %v1008_v62 = vfloor.f32 %v237_v23 }
  0xc5   : > { %v313_v1 = vadd.f32 -0.00019839335, %v305_v12  ;;  %v385_v34 = vadd.f32 -0.0013886763, %v377_v58  ;;  %v275_v4 = vsub.f32 %v259_v59, %v267_v55  ;;  %v231_v10 = vmul.f32 0.63661975, %v221_v2 }
  0xc6   : > { %v518_v63 = vsel %vm478_vm12, %v510_v56, %v494_v53  ;;  %v534_v0 = vsel %vm486_vm13, %v526_v57, %v502_v40  ;;  %v253_v5 = vmul.f32 1.5703125, %v1008_v62  ;;  %v269_v9 = vmul.f32 0.0004837513, %v1008_v62 }
  0xc7   : > { %542 = vst [vmem:[%s959_s30 + $0x60] sm:$0xff] %v518_v63  ;;  %v321_v6 = vmul.f32 %v313_v1, %v297_v15  ;;  %v393_v37 = vmul.f32 %v385_v34, %v297_v15  ;;  %v1014_v32 = vsub.f32 %v275_v4, %v283_v61  ;;  %v449_v16 = vand.u32 1, %v661_v44 }
  0xc8   : > { %550 = vst [vmem:[%s959_s30 + $0x68] sm:$0xff] %v534_v0  ;;  %v261_v60 = vsub.f32 %v969_v27, %v253_v5  ;;  %v465_v17 = vand.u32 2, %v661_v44  ;;  %v285_v41 = vmul.f32 7.54979e-08, %v1008_v62  ;;  %v665_v21 = vcvt.f32.s32 %v993_v50 }
  0xc9   : > { %v329_v13 = vadd.f32 0.008333329, %v321_v6  ;;  %v401_v14 = vadd.f32 0.041666623, %v393_v37  ;;  %v299_v18 = vmul.f32 %v1014_v32, %v1014_v32  ;;  %v239_v54 = vadd.f32 0.5, %v231_v10 }
  0xca   : > { %v277_v19 = vsub.f32 %v261_v60, %v269_v9  ;;  %vm457_vm14 = vcmp.ne.s32.totalorder %v449_v16, 0  ;;  %vm473_vm15 = vcmp.ne.s32.totalorder %v465_v17, 0  ;;  %v1028_v38 = vand.u32 1, %v665_v21 }
  0xcb   : > { %v337_v42 = vmul.f32 %v329_v13, %v297_v15  ;;  %v409_v20 = vmul.f32 %v401_v14, %v297_v15  ;;  %v307_v22 = vmul.f32 2.7183114e-06, %v299_v18  ;;  %v379_v25 = vmul.f32 2.4390449e-05, %v299_v18  ;;  %vm481_vm0 = vmxor %vm473_vm15, %vm457_vm14 }
  0xcc   : > { %v1022_v26 = vsub.f32 %v277_v19, %v285_v41  ;;  %v1024_v7 = vfloor.f32 %v239_v54  ;;  %v467_v23 = vand.u32 2, %v665_v21  ;;  %v669_v34 = vcvt.f32.s32 %v1008_v62 }
  0xcd   : > { %v345_v27 = vadd.f32 -0.16666667, %v337_v42  ;;  %v417_v29 = vadd.f32 -0.5, %v409_v20  ;;  %v315_v30 = vadd.f32 -0.00019839335, %v307_v22  ;;  %vm459_vm1 = vcmp.ne.s32.totalorder %v1028_v38, 0 }
  0xce   : > { %v387_v31 = vadd.f32 -0.0013886763, %v379_v25  ;;  %v301_v11 = vmul.f32 %v1022_v26, %v1022_v26  ;;  %v255_v36 = vmul.f32 1.5703125, %v1024_v7  ;;  %v271_v50 = vmul.f32 0.0004837513, %v1024_v7 }
  0xcf   : > { %v353_v33 = vmul.f32 %v345_v27, %v297_v15  ;;  %v425_v35 = vmul.f32 %v417_v29, %v297_v15  ;;  %v323_v3 = vmul.f32 %v315_v30, %v299_v18  ;;  %v287_v53 = vmul.f32 7.54979e-08, %v1024_v7 }
  0xd0   : > { %v395_v43 = vmul.f32 %v387_v31, %v299_v18  ;;  %v309_v8 = vmul.f32 2.7183114e-06, %v301_v11  ;;  %v381_v45 = vmul.f32 2.4390449e-05, %v301_v11  ;;  %v263_v48 = vsub.f32 %v221_v2, %v255_v36 }
  0xd1   : > { %v361_v46 = vadd.f32 1.0, %v353_v33  ;;  %v433_v47 = vadd.f32 1.0, %v425_v35  ;;  %v331_v39 = vadd.f32 0.008333329, %v323_v3  ;;  %vm475_vm2 = vcmp.ne.s32.totalorder %v467_v23, 0 }
  0xd2   : > { %v403_v28 = vadd.f32 0.041666623, %v395_v43  ;;  %v317_v51 = vadd.f32 -0.00019839335, %v309_v8  ;;  %v389_v24 = vadd.f32 -0.0013886763, %v381_v45  ;;  %v279_v15 = vsub.f32 %v263_v48, %v271_v50  ;;  %vm483_vm3 = vmxor %vm475_vm2, %vm459_vm1 }
  0xd3   : > { %v369_v52 = vmul.f32 %v361_v46, %v991_v49  ;;  %v339_v40 = vmul.f32 %v331_v39, %v299_v18  ;;  %v469_v27 = vand.u32 2, %v669_v34 }
  0xd4   : > { %v411_v55 = vmul.f32 %v403_v28, %v299_v18  ;;  %v325_v56 = vmul.f32 %v317_v51, %v301_v11  ;;  %v397_v58 = vmul.f32 %v389_v24, %v301_v11  ;;  %v1036_v44 = vsub.f32 %v279_v15, %v287_v53 }
  0xd5   : > { %v489_v57 = vsel %vm457_vm14, %v433_v47, %v369_v52  ;;  %v497_v12 = vsel %vm457_vm14, %v369_v52, %v433_v47  ;;  %v347_v63 = vadd.f32 -0.16666667, %v339_v40  ;;  %vm477_vm5 = vcmp.ne.s32.totalorder %v469_v27, 0 }
  0xd6   : > { %v505_v59 = vsub.f32 0.0, %v489_v57  ;;  %v521_v61 = vsub.f32 0.0, %v497_v12  ;;  %v419_v49 = vadd.f32 -0.5, %v411_v55  ;;  %v333_v0 = vadd.f32 0.008333329, %v325_v56 }
  0xd7   : > { %v405_v1 = vadd.f32 0.041666623, %v397_v58  ;;  %v303_v2 = vmul.f32 %v1036_v44, %v1036_v44  ;;  %v355_v6 = vmul.f32 %v347_v63, %v299_v18  ;;  %v673_v47 = vcvt.f32.s32 %v1024_v7 }
  0xd8   : > { %v513_v4 = vsel %vm473_vm15, %v505_v59, %v489_v57  ;;  %v529_v5 = vsel %vm481_vm0, %v521_v61, %v497_v12  ;;  %v427_v37 = vmul.f32 %v419_v49, %v299_v18  ;;  %v341_v60 = vmul.f32 %v333_v0, %v301_v11 }
  0xd9   : > { %537 = vst [vmem:[%s959_s30 + $0x10] sm:$0xff] %v513_v4  ;;  %v413_v9 = vmul.f32 %v405_v1, %v301_v11  ;;  %v311_v10 = vmul.f32 2.7183114e-06, %v303_v2  ;;  %v383_v13 = vmul.f32 2.4390449e-05, %v303_v2  ;;  %v363_v14 = vadd.f32 1.0, %v355_v6 }
  0xda   : > { %545 = vst [vmem:[%s959_s30 + $0x18] sm:$0xff] %v529_v5  ;;  %v349_v16 = vadd.f32 -0.16666667, %v341_v60  ;;  %v435_v42 = vadd.f32 1.0, %v427_v37  ;;  %v453_v18 = vand.u32 1, %v669_v34  ;;  %v455_v15 = vand.u32 1, %v673_v47 }
  0xdb   : > { %v421_v19 = vadd.f32 -0.5, %v413_v9  ;;  %v319_v62 = vadd.f32 -0.00019839335, %v311_v10  ;;  %v371_v41 = vmul.f32 %v363_v14, %v1014_v32  ;;  %v391_v17 = vadd.f32 -0.0013886763, %v383_v13 }
  0xdc   : > { %v357_v20 = vmul.f32 %v349_v16, %v301_v11  ;;  %vm461_vm4 = vcmp.ne.s32.totalorder %v453_v18, 0  ;;  %v471_v53 = vand.u32 2, %v673_v47  ;;  %vm463_vm7 = vcmp.ne.s32.totalorder %v455_v15, 0 }
  0xdd   : > { %v429_v21 = vmul.f32 %v421_v19, %v301_v11  ;;  %v327_v54 = vmul.f32 %v319_v62, %v303_v2  ;;  %v491_v22 = vsel %vm459_vm1, %v435_v42, %v371_v41  ;;  %v499_v25 = vsel %vm459_vm1, %v371_v41, %v435_v42  ;;  %vm485_vm6 = vmxor %vm477_vm5, %vm461_vm4 }
  0xde   : > { %v399_v29 = vmul.f32 %v391_v17, %v303_v2  ;;  %v507_v30 = vsub.f32 0.0, %v491_v22  ;;  %v523_v31 = vsub.f32 0.0, %v499_v25  ;;  %v365_v32 = vadd.f32 1.0, %v357_v20 }
  0xdf   : > { %v335_v11 = vadd.f32 0.008333329, %v327_v54  ;;  %v437_v43 = vadd.f32 1.0, %v429_v21  ;;  %vm479_vm8 = vcmp.ne.s32.totalorder %v471_v53, 0 }
  0xe0   : > { %v407_v33 = vadd.f32 0.041666623, %v399_v29  ;;  %v515_v35 = vsel %vm475_vm2, %v507_v30, %v491_v22  ;;  %v531_v36 = vsel %vm483_vm3, %v523_v31, %v499_v25  ;;  %v373_v3 = vmul.f32 %v365_v32, %v1022_v26  ;;  %vm487_vm9 = vmxor %vm479_vm8, %vm463_vm7 }
  0xe1   : > { %539 = vst [vmem:[%s959_s30 + $0x30] sm:$0xff] %v515_v35  ;;  %v343_v8 = vmul.f32 %v335_v11, %v303_v2 }
  0xe2   : > { %v415_v45 = vmul.f32 %v407_v33, %v303_v2  ;;  %547 = vst [vmem:[%s959_s30 + $0x38] sm:$0xff] %v531_v36  ;;  %v493_v46 = vsel %vm461_vm4, %v437_v43, %v373_v3  ;;  %v501_v38 = vsel %vm461_vm4, %v373_v3, %v437_v43 }
  0xe3   : > { %v509_v48 = vsub.f32 0.0, %v493_v46  ;;  %v525_v50 = vsub.f32 0.0, %v501_v38  ;;  %v351_v39 = vadd.f32 -0.16666667, %v343_v8 }
  0xe4   : > { %v423_v28 = vadd.f32 -0.5, %v415_v45 }
  0xe5   : > { %v517_v26 = vsel %vm477_vm5, %v509_v48, %v493_v46  ;;  %v533_v51 = vsel %vm485_vm6, %v525_v50, %v501_v38  ;;  %v359_v52 = vmul.f32 %v351_v39, %v303_v2 }
  0xe6   : > { %v431_v24 = vmul.f32 %v423_v28, %v303_v2  ;;  %541 = vst [vmem:[%s959_s30 + $0x50] sm:$0xff] %v517_v26 }
  0xe7   : > { %549 = vst [vmem:[%s959_s30 + $0x58] sm:$0xff] %v533_v51  ;;  %v367_v40 = vadd.f32 1.0, %v359_v52 }
  0xe8   : > { %v439_v55 = vadd.f32 1.0, %v431_v24 }
  0xe9   : > { %v375_v7 = vmul.f32 %v367_v40, %v1036_v44 }
  0xeb   : > { %v495_v23 = vsel %vm463_vm7, %v439_v55, %v375_v7  ;;  %v503_v56 = vsel %vm463_vm7, %v375_v7, %v439_v55 }
  0xec   : > { %v511_v57 = vsub.f32 0.0, %v495_v23  ;;  %v527_v12 = vsub.f32 0.0, %v503_v56 }
  0xee   : > { %v519_v58 = vsel %vm479_vm8, %v511_v57, %v495_v23  ;;  %v535_v59 = vsel %vm487_vm9, %v527_v12, %v503_v56 }
  0xef   : > { %543 = vst [vmem:[%s959_s30 + $0x70] sm:$0xff] %v519_v58 }
  0xf0   : > { %551 = vst [vmem:[%s959_s30 + $0x78] sm:$0xff] %v535_v59 }
  0xf1   : > { %742 = shalt.err (!%p739_p3)
}
  0xf2   : > { %s779_s25 = smov 256   ;;  %s780_s26 = smov 16  }
  0xf3   : > { %674 = dma.vmem_to_hbm [thread:$0]  (%p834_p5), %s567_s7, 2048, %s569_s8, %s553_s13, %s779_s25, %s779_s25, %s780_s26  }
  0xf4 PF: > { %p680_p4 = scmp.ge.s32.totalorder %s777_s12, 2  ;;  %s583_s27 = sand.u32 1, %s765_s9  }
  0xf5   : > { %s584_s28 = scalar_lea.sflag [#allocation3], %s583_s27 }
  0xf6   : > { %p677_p7 = pnand %p680_p4, %p838_p6 }
  0xf8   : > { %p678_p8 = pneg %p677_p7 }
  0xfa   : > { %760 = dma.done.wait (%p678_p8), %s584_s28, 2048  }
  0xfb   : > { %762 = vsyncadd (%p678_p8), %s584_s28, 4294965248  ;;  %p12_p9 = scmp.ge.s32.totalorder %s821_s15, 4   ;;  %s1104_s9 = smov %s769_s10 }
  0xfc   : > { %s1105_s10 = smov %s773_s11  ;;  %s1106_s11 = smov %s832_s18 }
  0xfd   : > { %s1107_s12 = smov %s821_s15  ;;  %14 = sbr.rel (!%p12_p9) target bundleno = 3 (0x3), region = 63 }
 0x102   :  { %590 = vsyncpa [#allocation3], 1 }
 0x103   :  { %592 = vsyncpa [#allocation3 + $0x1], 1 }

</bundles_post_ra>
